<compile_context>
chip_gen: v7x
topology: tpu7x:2x2x1
jax: 0.10.0
libtpu: 0.0.40
codegen_flags: <defaults>
</compile_context>

<pallas_src>
from functools import partial

import jax
import jax.numpy as jnp
from jax.experimental import pallas as pl
from jax.experimental.pallas import tpu as pltpu


# ---------------------------------------------------------------------------
# Kernels
# ---------------------------------------------------------------------------
def _mm_direct_kernel(x_ref, w_ref, *rest, has_bias):
    """Single-K-block tile:  o = x @ wT (+ b).  x:(tm,K) w:(K,tn) o:(tm,tn)."""
    if has_bias:
        b_ref, o_ref = rest
    else:
        (o_ref,) = rest
    acc = jnp.dot(x_ref[...], w_ref[...], preferred_element_type=jnp.float32)
    if has_bias:
        acc = acc + b_ref[...].astype(jnp.float32)
    o_ref[...] = acc.astype(o_ref.dtype)


def _mm_acc_kernel(x_ref, w_ref, *rest, has_bias, mask_k, cin, tk):
    """K-tiled tile with an f32 VMEM accumulator carried over grid axis 2."""
    if has_bias:
        b_ref, o_ref, acc_ref = rest
    else:
        o_ref, acc_ref = rest
    k = pl.program_id(2)

    @pl.when(k == 0)
    def _():
        acc_ref[...] = jnp.zeros_like(acc_ref)

    w = w_ref[...]
    if mask_k:
        # Last K block may run past Cin: zero the invalid weight rows so
        # out-of-bounds garbage never reaches the accumulator.
        valid = jnp.minimum(cin - k * tk, tk)
        row = jax.lax.broadcasted_iota(jnp.int32, w.shape, 0)
        w = jnp.where(row < valid, w, jnp.zeros_like(w))

    acc_ref[...] += jnp.dot(x_ref[...], w, preferred_element_type=jnp.float32)

    @pl.when(k == pl.num_programs(2) - 1)
    def _():
        out = acc_ref[...]
        if has_bias:
            out = out + b_ref[...].astype(jnp.float32)
        o_ref[...] = out.astype(o_ref.dtype)


def _conv1x1_kernel(x_ref, w_ref, *rest, has_bias):
    """NCHW-native pointwise conv tile:  o[n] = W @ x[n] (+ b).

    x:(1,Cin,tp)  w:(Cout,Cin)  b:(Cout,1)  o:(1,Cout,tp).  Spatial columns sit
    on the 128-lane axis, so stores stay lane-dense even for tiny Cout.
    """
    if has_bias:
        b_ref, o_ref = rest
    else:
        (o_ref,) = rest
    acc = jnp.dot(w_ref[...], x_ref[0], preferred_element_type=jnp.float32)
    if has_bias:
        acc = acc + b_ref[...].astype(jnp.float32)   # (Cout,1) broadcasts over tp
    o_ref[...] = acc[None, :, :].astype(o_ref.dtype)


# ---------------------------------------------------------------------------
# Wrappers around pallas_call
# ---------------------------------------------------------------------------
_VMEM_LIMIT = 32 * 1024 * 1024  # safe on v5e/v6e/v7x; working set is ~5 MiB


def _matmul_bias(x2d, wT, bias):
    """x2d:(M,Cin)  wT:(Cin,Cout)  bias:(Cout,) or None  ->  (M,Cout)."""
    M, Cin = x2d.shape
    Cout = wT.shape[1]
    has_bias = bias is not None

    # Tile selection (sized for the smallest VMEM generation, v7x: 64 MiB).
    tm = M if M <= 512 else 512          # big row tiles -> near HBM roofline
    tn = Cout if Cout <= 512 else 256    # 128/256-aligned lanes when tiled
    tk = Cin if Cin <= 1024 else 512     # single K block for small weights
    nm, nn, nk = pl.cdiv(M, tm), pl.cdiv(Cout, tn), pl.cdiv(Cin, tk)
    mask_k = (Cin % tk) != 0             # only possible when nk > 1

    itemsize = x2d.dtype.itemsize
    cost = pl.CostEstimate(
        flops=2 * M * Cin * Cout,
        transcendentals=0,
        bytes_accessed=(x2d.size * itemsize
                        + wT.size * wT.dtype.itemsize
                        + (Cout * bias.dtype.itemsize if has_bias else 0)
                        + M * Cout * itemsize))

    out_shape = jax.ShapeDtypeStruct((M, Cout), x2d.dtype)
    b_in = (bias.reshape(1, Cout),) if has_bias else ()

    if nk == 1:
        # Whole K in one block: direct write, no accumulator scratch.
        in_specs = [pl.BlockSpec((tm, Cin), lambda i, j: (i, 0)),
                    pl.BlockSpec((Cin, tn), lambda i, j: (0, j))]
        if has_bias:
            in_specs.append(pl.BlockSpec((1, tn), lambda i, j: (0, j)))
        return pl.pallas_call(
            partial(_mm_direct_kernel, has_bias=has_bias),
            out_shape=out_shape,
            grid_spec=pltpu.PrefetchScalarGridSpec(
                num_scalar_prefetch=0,
                grid=(nm, nn),
                in_specs=in_specs,
                out_specs=pl.BlockSpec((tm, tn), lambda i, j: (i, j)),
            ),
            compiler_params=pltpu.CompilerParams(
                dimension_semantics=("parallel", "parallel"),
                vmem_limit_bytes=_VMEM_LIMIT),
            cost_estimate=cost,
        )(x2d, wT, *b_in)

    # K-tiled path with f32 VMEM accumulator (reduction axis last).
    in_specs = [pl.BlockSpec((tm, tk), lambda i, j, k: (i, k)),
                pl.BlockSpec((tk, tn), lambda i, j, k: (k, j))]
    if has_bias:
        in_specs.append(pl.BlockSpec((1, tn), lambda i, j, k: (0, j)))
    return pl.pallas_call(
        partial(_mm_acc_kernel, has_bias=has_bias, mask_k=mask_k,
                cin=Cin, tk=tk),
        out_shape=out_shape,
        grid_spec=pltpu.PrefetchScalarGridSpec(
            num_scalar_prefetch=0,
            grid=(nm, nn, nk),
            in_specs=in_specs,
            out_specs=pl.BlockSpec((tm, tn), lambda i, j, k: (i, j)),
            scratch_shapes=[pltpu.VMEM((tm, tn), jnp.float32)],
        ),
        compiler_params=pltpu.CompilerParams(
            dimension_semantics=("parallel", "parallel", "arbitrary"),
            vmem_limit_bytes=_VMEM_LIMIT),
        cost_estimate=cost,
    )(x2d, wT, *b_in)


def _conv1x1_nchw(x3d, weight, bias):
    """x3d:(N,Cin,P)  weight:(Cout,Cin)  bias:(Cout,) or None -> (N,Cout,P)."""
    N, Cin, P = x3d.shape
    Cout = weight.shape[0]
    has_bias = bias is not None

    tp = P if P <= 512 else 512
    n_p = pl.cdiv(P, tp)

    itemsize = x3d.dtype.itemsize
    cost = pl.CostEstimate(
        flops=2 * N * P * Cin * Cout,
        transcendentals=0,
        bytes_accessed=(x3d.size * itemsize
                        + weight.size * weight.dtype.itemsize
                        + (Cout * bias.dtype.itemsize if has_bias else 0)
                        + N * Cout * P * itemsize))

    in_specs = [pl.BlockSpec((1, Cin, tp), lambda n, p: (n, 0, p)),
                pl.BlockSpec((Cout, Cin), lambda n, p: (0, 0))]
    b_in = ()
    if has_bias:
        in_specs.append(pl.BlockSpec((Cout, 1), lambda n, p: (0, 0)))
        b_in = (bias.reshape(Cout, 1),)

    return pl.pallas_call(
        partial(_conv1x1_kernel, has_bias=has_bias),
        out_shape=jax.ShapeDtypeStruct((N, Cout, P), x3d.dtype),
        grid_spec=pltpu.PrefetchScalarGridSpec(
            num_scalar_prefetch=0,
            grid=(N, n_p),
            in_specs=in_specs,
            out_specs=pl.BlockSpec((1, Cout, tp), lambda n, p: (n, 0, p)),
        ),
        compiler_params=pltpu.CompilerParams(
            dimension_semantics=("parallel", "parallel"),
            vmem_limit_bytes=_VMEM_LIMIT),
        cost_estimate=cost,
    )(x3d, weight, *b_in)


# ---------------------------------------------------------------------------
# Module-equivalent wrapper
# ---------------------------------------------------------------------------
class Linear:
    """JAX/Pallas equivalent of op_ds.utils.fnn.Linear (forward pass)."""

    # Channel sizes under which the whole (Cout, Cin) weight comfortably stays
    # resident in VMEM for the NCHW-native conv kernel.
    _NATIVE_CONV_MAX_CH = 1024

    def __init__(self, in_channels, out_channels, spatial_dim=0, bias=True,
                 key=None, dtype=jnp.float32):
        self.in_channels = in_channels
        self.out_channels = out_channels
        self.spatial_dim = spatial_dim
        if key is None:
            key = jax.random.PRNGKey(0)
        kw, kb = jax.random.split(key)
        bound = 1.0 / (in_channels ** 0.5)  # PyTorch-style uniform init
        # torch.nn.Linear weight: (out, in); Conv{d}d weight with kernel_size=1
        # is (out, in, 1, ..., 1) == the same (out, in) matrix.
        # NOTE: on v6e/v7x pass dtype=jnp.bfloat16 for ~2-3x MXU throughput
        # (accumulation stays in f32 inside the kernels).
        self.weight = jax.random.uniform(
            kw, (out_channels, in_channels), jnp.float32, -bound, bound
        ).astype(dtype)
        # Transposed copy computed ONCE here, so calls never pay a per-call
        # HBM transpose of the weight.
        self.wT = self.weight.T
        self.bias = (
            jax.random.uniform(kb, (out_channels,), jnp.float32, -bound, bound)
            if bias else None)

    def __call__(self, x):
        if self.spatial_dim == 0:
            # F.linear: operates on the last axis; leading axes are rows.
            lead = x.shape[:-1]
            y2d = _matmul_bias(x.reshape(-1, self.in_channels), self.wT, self.bias)
            return y2d.reshape(*lead, self.out_channels)

        # conv{d}d with kernel_size=1 on N, C, *spatial (NCHW for d=2).
        d = self.spatial_dim
        assert x.ndim == 2 + d and x.shape[1] == self.in_channels
        n, spatial = x.shape[0], x.shape[2:]
        p = 1
        for s in spatial:
            p *= s

        if (self.in_channels <= self._NATIVE_CONV_MAX_CH
                and self.out_channels <= self._NATIVE_CONV_MAX_CH):
            # NCHW-native: no transpose round trip; reshapes are free.
            y3d = _conv1x1_nchw(x.reshape(n, self.in_channels, p),
                                self.weight, self.bias)
            return y3d.reshape((n, self.out_channels) + spatial)

        # Fallback for very wide channel counts: channels-last matmul path
        # (pays two transposes but gets full (M, N, K) tiling).
        perm = (0,) + tuple(range(2, 2 + d)) + (1,)
        x_cl = jnp.transpose(x, perm).reshape(-1, self.in_channels)
        y2d = _matmul_bias(x_cl, self.wT, self.bias)
        y_cl = y2d.reshape((n,) + spatial + (self.out_channels,))
        inv_perm = (0, 1 + d) + tuple(range(1, 1 + d))
        return jnp.transpose(y_cl, inv_perm)  # back to N, Cout, *S


# ---------------------------------------------------------------------------
# Demo / self-check
# ---------------------------------------------------------------------------
if __name__ == "__main__":
    key = jax.random.PRNGKey(0)
    k0, k1, k2, k3 = jax.random.split(key, 4)

    ok = True

    # Case 1: spatial_dim = 0 (plain linear), x: (batch=2, seq=8, hidden=32)
    in_c, out_c = 32, 16
    lin0 = Linear(in_c, out_c, spatial_dim=0, bias=True, key=k0)
    x0 = jax.random.normal(k1, (2, 8, in_c), jnp.float32)
    y0 = jax.block_until_ready(lin0(x0))
    ref0 = x0 @ lin0.weight.T + lin0.bias
    ok &= bool(jnp.allclose(y0, ref0, atol=1e-5, rtol=1e-5))
    ok &= y0.shape == (2, 8, out_c)

    # Case 2: spatial_dim = 0, bias=False
    lin0n = Linear(in_c, out_c, spatial_dim=0, bias=False, key=k3)
    y0n = jax.block_until_ready(lin0n(x0))
    ref0n = x0 @ lin0n.weight.T
    ok &= bool(jnp.allclose(y0n, ref0n, atol=1e-5, rtol=1e-5))

    # Case 3: spatial_dim = 2 (1x1 conv), x: NCHW = (2, 4, 16, 16)
    in_c, out_c = 4, 8
    lin2 = Linear(in_c, out_c, spatial_dim=2, bias=True, key=k2)
    x2 = jax.random.normal(k1, (2, in_c, 16, 16), jnp.float32)
    y2 = jax.block_until_ready(lin2(x2))
    ref2 = (jnp.einsum("nchw,oc->nohw", x2, lin2.weight)
            + lin2.bias[None, :, None, None])
    ok &= bool(jnp.allclose(y2, ref2, atol=1e-5, rtol=1e-5))
    ok &= y2.shape == (2, out_c, 16, 16)

    print("KERNEL_OK" if ok else "MISMATCH")
</pallas_src>

<mosaic_0001>
module attributes {stable_mosaic.version = 11 : i64} {
  func.func @_mm_direct_kernel(%arg0: i32, %arg1: i32, %arg2: memref<16x32xf32, #tpu.memory_space<vmem>>, %arg3: memref<32x16xf32, #tpu.memory_space<vmem>>, %arg4: memref<1x16xf32, #tpu.memory_space<vmem>>, %arg5: memref<16x16xf32, #tpu.memory_space<vmem>>) attributes {dimension_semantics = [#tpu.dimension_semantics<parallel>, #tpu.dimension_semantics<parallel>], iteration_bounds = array<i64: 1, 1>, scalar_prefetch = 0 : i64, scratch_operands = 0 : i64, tpu.core_type = #tpu.core_type<tc>, window_params = [{transform_indices = @transform_0, window_bounds = array<i64: 16, 32>}, {transform_indices = @transform_1, window_bounds = array<i64: 32, 16>}, {transform_indices = @transform_2, window_bounds = array<i64: 1, 16>}, {transform_indices = @transform_3, window_bounds = array<i64: 16, 16>}]} {
    %c0 = arith.constant 0 : index
    %c0_0 = arith.constant 0 : index
    %0 = vector.load %arg2[%c0, %c0_0] : memref<16x32xf32, #tpu.memory_space<vmem>>, vector<16x32xf32>
    %c0_1 = arith.constant 0 : index
    %c0_2 = arith.constant 0 : index
    %1 = vector.load %arg3[%c0_1, %c0_2] : memref<32x16xf32, #tpu.memory_space<vmem>>, vector<32x16xf32>
    %cst = arith.constant dense<0.000000e+00> : vector<16x16xf32>
    %2 = tpu.matmul %0, %1, %cst {dimension_numbers = #tpu.dot_dimension_numbers<[1], [0], [0], [1], [0, 0, 1, 1], [], []>} : vector<16x32xf32>, vector<32x16xf32>, vector<16x16xf32> -> vector<16x16xf32>
    %c0_3 = arith.constant 0 : index
    %c0_4 = arith.constant 0 : index
    %3 = vector.load %arg4[%c0_3, %c0_4] : memref<1x16xf32, #tpu.memory_space<vmem>>, vector<1x16xf32>
    %4 = vector.broadcast %3 : vector<1x16xf32> to vector<16x16xf32>
    %5 = arith.addf %2, %4 : vector<16x16xf32>
    %c0_5 = arith.constant 0 : index
    %c0_6 = arith.constant 0 : index
    %6 = vector.load %arg5[%c0_5, %c0_6] : memref<16x16xf32, #tpu.memory_space<vmem>>, vector<16x16xf32>
    tpu.vector_store %arg5[%c0_5, %c0_6], %5 {strides = array<i32>} : memref<16x16xf32, #tpu.memory_space<vmem>>, vector<16x16xf32>,
    return
  }
  func.func @transform_0(%arg0: i32, %arg1: i32) -> (i32, i32) {
    %c0_i32 = arith.constant 0 : i32
    %c0_i32_0 = arith.constant 0 : i32
    return %arg0, %c0_i32 : i32, i32
  }
  func.func @transform_1(%arg0: i32, %arg1: i32) -> (i32, i32) {
    %c0_i32 = arith.constant 0 : i32
    %c0_i32_0 = arith.constant 0 : i32
    return %c0_i32, %arg1 : i32, i32
  }
  func.func @transform_2(%arg0: i32, %arg1: i32) -> (i32, i32) {
    %c0_i32 = arith.constant 0 : i32
    %c0_i32_0 = arith.constant 0 : i32
    return %c0_i32, %arg1 : i32, i32
  }
  func.func @transform_3(%arg0: i32, %arg1: i32) -> (i32, i32) {
    %c0_i32 = arith.constant 0 : i32
    return %arg0, %arg1 : i32, i32
  }
}

</mosaic_0001>

<bundles_post_ra>
// kernel: tpu_custom_call.1
= control target key start
LH: loop header
LB: loop body
LE: loop exit
PB: predicated region body
PF: predicated region fallthrough
CT: control target
= control target key end

     0   :  { %vm28_vm0 = vcmask 261120   ;;  %s240_s0 = inlined_call_operand.vmem [shape: f32[16,32], index: 0, kind: input, shape index: {}]   ;;  %s241_s1 = inlined_call_operand.vmem [shape: f32[32,16], index: 1, kind: input, shape index: {}]   ;;  %s242_s2 = inlined_call_operand.vmem [shape: f32[1,16], index: 2, kind: input, shape index: {}]   ;;  %s243_s3 = inlined_call_operand.hbm [shape: f32[16,16], index: 3, kind: output, shape index: {}]  }
   0x1   :  { %v17_v0 = vld [vmem:[%s241_s1] sm:$0xff]  ;;  %v18_v1 = vld [vmem:[%s241_s1 + $0x8] sm:$0xff]  ;;  %v19_v2 = vld [vmem:[%s241_s1 + $0x10] sm:$0xff] }
   0x2   :  { %v149_v3 = vpack.c.bf16 %v18_v1, %v17_v0  ;;  %v20_v4 = vld [vmem:[%s241_s1 + $0x18] sm:$0xff]  ;;  %v15_v5 = vld [vmem:[%s240_s0] sm:$0xff] }
   0x3   :  { %v153_v6 = vpack.c.bf16 %v20_v4, %v19_v2  ;;  %146 = vmatprep.mubr.msk.f32.mxu0 %vm28_vm0, %v15_v5 }
   0x4   :  { %8 = vsyncpa [#allocation3], 0  ;;  %150 = vmatprep.subr.bf16.mxu0 %v149_v3  ;;  %v16_v7 = vld [vmem:[%s240_s0 + $0x8] sm:$0xff]  ;;  %v129_v8 = vld [vmem:[%s242_s2] ss:$0 sm:$0xff]  ;;  %s184_s1 = smov [#allocation2]  }
   0x5   :  { %152 = vmatpush3.bf16.msra.mxu0 %v149_v3  ;;  %s118_s26 = sshll.u32 %s184_s1, 4  ;;  %vm110_vm1 = vcmask 130048   ;;  %s119_s26 = int_to_ptr.vmem [resolvable:$true] %s118_s26 }
   0x6   :  { %154 = vmatprep.subr.bf16.mxu0 %v153_v6  ;;  %s160_s27 = scalar_lea.vmem %s119_s26, 256  ;;  %p165_p1 = scmp.lt.s32.totalorder %s119_s26, %s119_s26 }
   0x7   :  { %p161_p0 = scmp.ne.s32.totalorder %s119_s26, %s160_s27  ;;  %p166_p2 = scmp.lt.s32.totalorder %s160_s27, %s160_s27 }
   0x9   :  { %156 = vmatpush3.bf16.msra.mxu0 %v153_v6  ;;  %p167_p3 = por %p166_p2, %p165_p1 }
   0xb   :  { %p168_p4 = pnand %p167_p3, %p161_p0 }
   0xc   :  { %147 = vmatmul.mubr.msk.f32.vlgmr.msra.gmra.mrb[0].mxu0 %vm28_vm0, %v16_v7 }
  0xdf   :  { %v148_v9 = vpop.f32.mrb[0].mxu0 }
  0xe0   :  { %v107_v10 = vadd.f32 %v148_v9, %v129_v8  ;;  %v101_v11 = vpop.f32.mrb[1].mxu0 }
  0xe1   :  { %v102_v12 = vadd.f32 %v129_v8, %v101_v11 }
  0xe2   :  { %112 = vst.msk [vmem:[#allocation2 + $0x8] sm:$0xff] %vm110_vm1, %v107_v10 }
  0xe3   :  { %111 = vst.msk [vmem:[#allocation2] sm:$0xff] %vm110_vm1, %v102_v12 }
  0xe4   :  { %171 = shalt.err (!%p168_p4)
}
  0xe5   :  { %s172_s2 = scalar_lea.hbm %s243_s3, 256 }
  0xe6   :  { %p173_p5 = scmp.ne.s32.totalorder %s243_s3, %s172_s2  ;;  %p176_p6 = scmp.lt.u32.totalorder %s172_s2, %s243_s3 }
  0xe8   :  { %p178_p7 = pnand %p176_p6, %p173_p5 }
  0xea   :  { %181 = shalt.err (!%p178_p7)
}
  0xeb   :  { %s185_s6 = smov 128   ;;  %s186_s7 = smov 8  }
  0xec   :  { %124 = dma.vmem_to_hbm [thread:$0]  %s119_s26, 256, %s243_s3, [#allocation3], %s185_s6, %s185_s6, %s186_s7  }
  0xed   :  { %182 = dma.done.wait [#allocation3], 256  }
  0xee   :  { %183 = vsyncadd [#allocation3], 4294967040 }
  0xef   :  { %128 = vsyncpa [#allocation3], 1 }

</bundles_post_ra>
